<compile_context>
chip_gen: v6e
topology: v6e:2x2x1
jax: 0.10.0
libtpu: 0.0.40
codegen_flags: <defaults>
</compile_context>

<pallas_src>
import functools
import math

import jax
import jax.numpy as jnp
from jax.experimental import pallas as pl
from jax.experimental.pallas import tpu as pltpu


def _cdiv(a, b):
    return -(-a // b)


def _round_up(a, b):
    return _cdiv(a, b) * b


def _label_smoothing_kernel(x_ref, tgt_ref, out_ref, *,
                            padding_idx, smooth_val, confidence,
                            vocab, num_vocab_blocks):
    j = pl.program_id(1)                      # vocab (reduction) axis, innermost

    @pl.when(j == 0)
    def _init():
        out_ref[...] = jnp.zeros_like(out_ref)

    x = x_ref[...].astype(jnp.float32)        # (tile_n, tile_v) log-probabilities
    tgt = tgt_ref[...]                        # (tile_n, 1) int32
    tn, tv = x.shape

    lane = jax.lax.broadcasted_iota(jnp.int32, (tn, tv), 1)
    row_keep = tgt != padding_idx             # also masks the rows that pad the grid

    # Ragged last vocab block: zero invalid lanes with a select on x itself
    # (out-of-bounds VMEM may hold NaN/Inf; 0 * NaN would poison the sums).
    v_rem = vocab - (num_vocab_blocks - 1) * tv     # compile-time constant
    if v_rem != tv:
        col_limit = jnp.where(j == num_vocab_blocks - 1, v_rem, tv)
        x = jnp.where(lane < col_limit, x, 0.0)

    # Decomposition of sum_c coef_c * x_c with coef == -true_dist:
    #   -smooth_val * rowsum(x) + (smooth_val - confidence) * x[target]
    # (padding-column correction handled below on its single vocab block).
    local_tgt = tgt - j * tv                  # (tile_n, 1)
    row_sum = jnp.sum(x, axis=-1, keepdims=True)
    x_tgt = jnp.sum(jnp.where(lane == local_tgt, x, 0.0), axis=-1, keepdims=True)
    per_row = (-smooth_val) * row_sum + (smooth_val - confidence) * x_tgt

    # Rows whose target is the padding index contribute nothing.  Select, not
    # multiply: a ragged last row block's invalid rows may hold NaN.
    per_row = jnp.where(row_keep, per_row, 0.0)

    # One scalar per grid step, broadcast-added into this row block's resident slab.
    out_ref[...] += jnp.sum(per_row)

    # Padding-column correction (+smooth_val * x[:, padding_idx] per kept row):
    # only the one vocab block containing that column pays for it.
    if smooth_val != 0.0:
        pad_block, pad_col = divmod(padding_idx, tv)   # compile-time constants

        @pl.when(j == pad_block)
        def _pad_fix():
            pad_vals = x[:, pad_col:pad_col + 1]       # (tile_n, 1), static slice
            contrib = jnp.where(row_keep, smooth_val * pad_vals, 0.0)
            out_ref[...] += jnp.sum(contrib)


def label_smoothing_loss(x, target, *, size, padding_idx, smoothing,
                         tile_n=512, tile_v=2048, vmem_limit_bytes=None):
    """x: (N, size) float (f32 or bf16) log-probs; target: (N,) int ids. Scalar loss."""
    n, v = x.shape
    assert v == size and size > 2
    assert target.shape == (n,)

    confidence = 1.0 - smoothing
    smooth_val = smoothing / (size - 2)

    # Align tiles to (8, 128).  Never pad the big x array: ragged edge blocks are
    # masked inside the kernel instead.
    tile_v = min(_round_up(tile_v, 128), _round_up(v, 128))
    tile_n = min(_round_up(tile_n, 8), _round_up(n, 8))
    # Give the 'parallel' row axis at least two blocks so both TensorCores of a
    # v7x megacore get work even for small batch*seq.
    if n >= 16:
        tile_n = min(tile_n, _round_up(_cdiv(n, 2), 8))

    num_row_blocks = _cdiv(n, tile_n)
    num_vocab_blocks = _cdiv(v, tile_v)
    n_pad = num_row_blocks * tile_n

    # Pad only the tiny target vector (with padding_idx so the extra rows are
    # masked out); x itself is streamed unpadded.
    tgt = target.astype(jnp.int32)
    if n_pad != n:
        tgt = jnp.pad(tgt, (0, n_pad - n), constant_values=padding_idx)
    tgt2d = tgt.reshape(n_pad, 1)

    # Raise the scoped-VMEM limit only when the (double-buffered) x block needs it;
    # stay well under v7x's 64 MiB physical VMEM.
    if vmem_limit_bytes is None:
        need = 2 * tile_n * tile_v * jnp.dtype(x.dtype).itemsize
        if need > 12 * 1024 * 1024:
            vmem_limit_bytes = min(2 * need, 48 * 1024 * 1024)

    kernel = functools.partial(
        _label_smoothing_kernel,
        padding_idx=padding_idx, smooth_val=smooth_val, confidence=confidence,
        vocab=v, num_vocab_blocks=num_vocab_blocks)

    partials = pl.pallas_call(
        kernel,
        out_shape=jax.ShapeDtypeStruct((num_row_blocks, 8, 128), jnp.float32),
        grid_spec=pltpu.PrefetchScalarGridSpec(
            num_scalar_prefetch=0,
            grid=(num_row_blocks, num_vocab_blocks),
            in_specs=[
                pl.BlockSpec((tile_n, tile_v), lambda i, j: (i, j)),
                # Depends only on i -> the tiny target block is DMA'd once per
                # row block, not once per vocab step.
                pl.BlockSpec((tile_n, 1), lambda i, j: (i, 0)),
            ],
            # Per-row-block resident accumulator slab (no shared scalar RMW).
            out_specs=pl.BlockSpec((1, 8, 128), lambda i, j: (i, 0, 0)),
        ),
        compiler_params=pltpu.CompilerParams(
            dimension_semantics=("parallel", "arbitrary"),
            vmem_limit_bytes=vmem_limit_bytes),
    )(x, tgt2d)

    # Entropy term sum_c t*log(t) is a compile-time constant per non-padding row;
    # add it once here (uses the original, unpadded targets).
    c0 = 0.0
    if smooth_val > 0.0:
        c0 += (size - 2) * smooth_val * math.log(smooth_val)
    if confidence > 0.0:
        c0 += confidence * math.log(confidence)
    n_keep = jnp.sum((target != padding_idx).astype(jnp.float32))

    return jnp.sum(partials[:, 0, 0]) + jnp.float32(c0) * n_keep


def _reference_loss(x, target, *, size, padding_idx, smoothing):
    n, v = x.shape
    x = x.astype(jnp.float32)
    confidence = 1.0 - smoothing
    col = jnp.arange(v)[None, :]
    tgt = target[:, None]
    true_dist = jnp.full((n, v), smoothing / (size - 2), dtype=jnp.float32)
    true_dist = jnp.where(col == tgt, confidence, true_dist)
    true_dist = jnp.where(col == padding_idx, 0.0, true_dist)
    true_dist = jnp.where(tgt == padding_idx, 0.0, true_dist)
    elem = jnp.where(true_dist > 0.0,
                     true_dist * (jnp.log(jnp.maximum(true_dist, 1e-30)) - x),
                     0.0)
    return jnp.sum(elem)


if __name__ == "__main__":
    key = jax.random.PRNGKey(0)
    k1, k2, k3, k4, k5, k6 = jax.random.split(key, 6)

    # Case 1: small shapes implied by the module (vocab=32, 16 token rows),
    # padding_idx=0.  Exercises the <=one-tile vocab + 2-row-block split path.
    SIZE, N, SMOOTHING, PAD = 32, 16, 0.1, 0
    x1 = jax.nn.log_softmax(jax.random.normal(k1, (N, SIZE), jnp.float32), -1)
    t1 = jax.random.randint(k2, (N,), 0, SIZE, dtype=jnp.int32)
    t1 = t1.at[3].set(PAD).at[10].set(PAD)
    loss1 = jax.block_until_ready(
        label_smoothing_loss(x1, t1, size=SIZE, padding_idx=PAD, smoothing=SMOOTHING))
    ref1 = _reference_loss(x1, t1, size=SIZE, padding_idx=PAD, smoothing=SMOOTHING)
    assert jnp.allclose(loss1, ref1, rtol=1e-5, atol=1e-3), (loss1, ref1)

    # Case 2: non-multiple shapes + forced small tiles -> ragged last row block
    # AND ragged last vocab block, padding column living in a middle vocab block.
    SIZE2, N2, SMOOTHING2, PAD2 = 300, 40, 0.2, 130
    x2 = jax.nn.log_softmax(jax.random.normal(k3, (N2, SIZE2), jnp.float32), -1)
    t2 = jax.random.randint(k4, (N2,), 0, SIZE2, dtype=jnp.int32)
    t2 = t2.at[0].set(PAD2).at[17].set(PAD2).at[39].set(PAD2)
    loss2 = jax.block_until_ready(
        label_smoothing_loss(x2, t2, size=SIZE2, padding_idx=PAD2,
                             smoothing=SMOOTHING2, tile_n=16, tile_v=128))
    ref2 = _reference_loss(x2, t2, size=SIZE2, padding_idx=PAD2, smoothing=SMOOTHING2)
    assert jnp.allclose(loss2, ref2, rtol=1e-5, atol=1e-3), (loss2, ref2)

    # Case 3: bf16 log-probs streamed from HBM (kernel upcasts to f32 after load).
    SIZE3, N3, SMOOTHING3, PAD3 = 512, 64, 0.1, 0
    x3 = jax.nn.log_softmax(jax.random.normal(k5, (N3, SIZE3), jnp.float32), -1)
    x3_bf16 = x3.astype(jnp.bfloat16)
    t3 = jax.random.randint(k6, (N3,), 0, SIZE3, dtype=jnp.int32)
    t3 = t3.at[5].set(PAD3).at[41].set(PAD3)
    loss3 = jax.block_until_ready(
        label_smoothing_loss(x3_bf16, t3, size=SIZE3, padding_idx=PAD3,
                             smoothing=SMOOTHING3))
    ref3 = _reference_loss(x3_bf16.astype(jnp.float32), t3, size=SIZE3,
                           padding_idx=PAD3, smoothing=SMOOTHING3)
    assert jnp.allclose(loss3, ref3, rtol=1e-4, atol=1e-2), (loss3, ref3)

    print("KERNEL_OK")
</pallas_src>

<mosaic_0001>
module attributes {stable_mosaic.version = 11 : i64} {
  func.func @_label_smoothing_kernel(%arg0: i32, %arg1: i32, %arg2: memref<8x128xf32, #tpu.memory_space<vmem>>, %arg3: memref<8x1xi32, #tpu.memory_space<vmem>>, %arg4: memref<1x8x128xf32, #tpu.memory_space<vmem>>) attributes {dimension_semantics = [#tpu.dimension_semantics<parallel>, #tpu.dimension_semantics<arbitrary>], iteration_bounds = array<i64: 2, 1>, scalar_prefetch = 0 : i64, scratch_operands = 0 : i64, tpu.core_type = #tpu.core_type<tc>, window_params = [{transform_indices = @transform_0, window_bounds = array<i64: 8, 128>}, {transform_indices = @transform_1, window_bounds = array<i64: 8, 1>}, {transform_indices = @transform_2, window_bounds = array<i64: 1, 8, 128>}]} {
    %c0_i32 = arith.constant 0 : i32
    %0 = arith.cmpi eq, %arg1, %c0_i32 : i32
    %1 = arith.extui %0 : i1 to i32
    %c0_i32_0 = arith.constant 0 : i32
    %2 = arith.cmpi ne, %1, %c0_i32_0 : i32
    scf.if %2 {
      %cst_22 = arith.constant 0.000000e+00 : f32
      %43 = vector.broadcast %cst_22 : f32 to vector<1x8x128xf32>
      %c0_23 = arith.constant 0 : index
      %c0_24 = arith.constant 0 : index
      %c0_25 = arith.constant 0 : index
      %44 = vector.load %arg4[%c0_23, %c0_24, %c0_25] : memref<1x8x128xf32, #tpu.memory_space<vmem>>, vector<1x8x128xf32>
      tpu.vector_store %arg4[%c0_23, %c0_24, %c0_25], %43 {strides = array<i32>} : memref<1x8x128xf32, #tpu.memory_space<vmem>>, vector<1x8x128xf32>,
    } else {
    }
    %c0 = arith.constant 0 : index
    %c0_1 = arith.constant 0 : index
    %3 = vector.load %arg2[%c0, %c0_1] : memref<8x128xf32, #tpu.memory_space<vmem>>, vector<8x128xf32>
    %c0_2 = arith.constant 0 : index
    %c0_3 = arith.constant 0 : index
    %4 = vector.load %arg3[%c0_2, %c0_3] : memref<8x1xi32, #tpu.memory_space<vmem>>, vector<8x1xi32>
    %5 = tpu.iota {dimensions = array<i32: 1>} : vector<8x128xi32>
    %c0_i32_4 = arith.constant 0 : i32
    %6 = vector.broadcast %c0_i32_4 : i32 to vector<8x1xi32>
    %7 = arith.cmpi ne, %4, %6 : vector<8x1xi32>
    %c0_i32_5 = arith.constant 0 : i32
    %8 = arith.cmpi eq, %arg1, %c0_i32_5 : i32
    %c32_i32 = arith.constant 32 : i32
    %c128_i32 = arith.constant 128 : i32
    %9 = arith.select %8, %c32_i32, %c128_i32 : i32
    %10 = vector.broadcast %9 : i32 to vector<8x128xi32>
    %11 = arith.cmpi slt, %5, %10 : vector<8x128xi32>
    %cst = arith.constant 0.000000e+00 : f32
    %12 = vector.broadcast %cst : f32 to vector<8x128xf32>
    %13 = arith.select %11, %3, %12 : vector<8x128xi1>, vector<8x128xf32>
    %c128_i32_6 = arith.constant 128 : i32
    %14 = arith.muli %arg1, %c128_i32_6 : i32
    %15 = vector.broadcast %14 : i32 to vector<8x1xi32>
    %16 = arith.subi %4, %15 : vector<8x1xi32>
    %cst_7 = arith.constant dense<0.000000e+00> : vector<8xf32>
    %17 = vector.multi_reduction <add>, %13, %cst_7 [1] : vector<8x128xf32> to vector<8xf32>
    %18 = vector.shape_cast %17 : vector<8xf32> to vector<8x1xf32>
    %19 = vector.broadcast %16 : vector<8x1xi32> to vector<8x128xi32>
    %20 = arith.cmpi eq, %5, %19 : vector<8x128xi32>
    %cst_8 = arith.constant 0.000000e+00 : f32
    %21 = vector.broadcast %cst_8 : f32 to vector<8x128xf32>
    %22 = arith.select %20, %13, %21 : vector<8x128xi1>, vector<8x128xf32>
    %cst_9 = arith.constant dense<0.000000e+00> : vector<8xf32>
    %23 = vector.multi_reduction <add>, %22, %cst_9 [1] : vector<8x128xf32> to vector<8xf32>
    %24 = vector.shape_cast %23 : vector<8xf32> to vector<8x1xf32>
    %cst_10 = arith.constant -0.00333333341 : f32
    %25 = vector.broadcast %cst_10 : f32 to vector<8x1xf32>
    %26 = arith.mulf %25, %18 : vector<8x1xf32>
    %cst_11 = arith.constant -0.896666646 : f32
    %27 = vector.broadcast %cst_11 : f32 to vector<8x1xf32>
    %28 = arith.mulf %27, %24 : vector<8x1xf32>
    %29 = arith.addf %26, %28 : vector<8x1xf32>
    %cst_12 = arith.constant 0.000000e+00 : f32
    %30 = vector.broadcast %cst_12 : f32 to vector<8x1xf32>
    %31 = arith.select %7, %29, %30 : vector<8x1xi1>, vector<8x1xf32>
    %c0_13 = arith.constant 0 : index
    %c0_14 = arith.constant 0 : index
    %c0_15 = arith.constant 0 : index
    %32 = vector.load %arg4[%c0_13, %c0_14, %c0_15] : memref<1x8x128xf32, #tpu.memory_space<vmem>>, vector<1x8x128xf32>
    %33 = vector.shape_cast %31 : vector<8x1xf32> to vector<1x8x1xf32>
    %cst_16 = arith.constant dense<0.000000e+00> : vector<1xf32>
    %34 = vector.multi_reduction <add>, %33, %cst_16 [1, 2] : vector<1x8x1xf32> to vector<1xf32>
    %35 = vector.shape_cast %34 : vector<1xf32> to vector<1x1x1xf32>
    %36 = vector.extract %35[0, 0, 0] : f32 from vector<1x1x1xf32>
    %37 = vector.broadcast %36 : f32 to vector<1x8x128xf32>
    %38 = arith.addf %32, %37 : vector<1x8x128xf32>
    %c0_17 = arith.constant 0 : index
    %c0_18 = arith.constant 0 : index
    %c0_19 = arith.constant 0 : index
    %39 = vector.load %arg4[%c0_17, %c0_18, %c0_19] : memref<1x8x128xf32, #tpu.memory_space<vmem>>, vector<1x8x128xf32>
    tpu.vector_store %arg4[%c0_17, %c0_18, %c0_19], %38 {strides = array<i32>} : memref<1x8x128xf32, #tpu.memory_space<vmem>>, vector<1x8x128xf32>,
    %c0_i32_20 = arith.constant 0 : i32
    %40 = arith.cmpi eq, %arg1, %c0_i32_20 : i32
    %41 = arith.extui %40 : i1 to i32
    %c0_i32_21 = arith.constant 0 : i32
    %42 = arith.cmpi ne, %41, %c0_i32_21 : i32
    scf.if %42 {
      %43 = vector.extract_strided_slice %13 {offsets = [0, 0], sizes = [8, 1], strides = [1, 1]} : vector<8x128xf32> to vector<8x1xf32>
      %cst_22 = arith.constant 0.00333333341 : f32
      %44 = vector.broadcast %cst_22 : f32 to vector<8x1xf32>
      %45 = arith.mulf %44, %43 : vector<8x1xf32>
      %cst_23 = arith.constant 0.000000e+00 : f32
      %46 = vector.broadcast %cst_23 : f32 to vector<8x1xf32>
      %47 = arith.select %7, %45, %46 : vector<8x1xi1>, vector<8x1xf32>
      %c0_24 = arith.constant 0 : index
      %c0_25 = arith.constant 0 : index
      %c0_26 = arith.constant 0 : index
      %48 = vector.load %arg4[%c0_24, %c0_25, %c0_26] : memref<1x8x128xf32, #tpu.memory_space<vmem>>, vector<1x8x128xf32>
      %49 = vector.shape_cast %47 : vector<8x1xf32> to vector<1x8x1xf32>
      %cst_27 = arith.constant dense<0.000000e+00> : vector<1xf32>
      %50 = vector.multi_reduction <add>, %49, %cst_27 [1, 2] : vector<1x8x1xf32> to vector<1xf32>
      %51 = vector.shape_cast %50 : vector<1xf32> to vector<1x1x1xf32>
      %52 = vector.extract %51[0, 0, 0] : f32 from vector<1x1x1xf32>
      %53 = vector.broadcast %52 : f32 to vector<1x8x128xf32>
      %54 = arith.addf %48, %53 : vector<1x8x128xf32>
      %c0_28 = arith.constant 0 : index
      %c0_29 = arith.constant 0 : index
      %c0_30 = arith.constant 0 : index
      %55 = vector.load %arg4[%c0_28, %c0_29, %c0_30] : memref<1x8x128xf32, #tpu.memory_space<vmem>>, vector<1x8x128xf32>
      tpu.vector_store %arg4[%c0_28, %c0_29, %c0_30], %54 {strides = array<i32>} : memref<1x8x128xf32, #tpu.memory_space<vmem>>, vector<1x8x128xf32>,
    } else {
    }
    return
  }
  func.func @transform_0(%arg0: i32, %arg1: i32) -> (i32, i32) {
    %c0_i32 = arith.constant 0 : i32
    return %arg0, %arg1 : i32, i32
  }
  func.func @transform_1(%arg0: i32, %arg1: i32) -> (i32, i32) {
    %c0_i32 = arith.constant 0 : i32
    %c0_i32_0 = arith.constant 0 : i32
    return %arg0, %c0_i32 : i32, i32
  }
  func.func @transform_2(%arg0: i32, %arg1: i32) -> (i32, i32, i32) {
    %c0_i32 = arith.constant 0 : i32
    %c0_i32_0 = arith.constant 0 : i32
    %c0_i32_1 = arith.constant 0 : i32
    return %arg0, %c0_i32, %c0_i32_0 : i32, i32, i32
  }
}

</mosaic_0001>

<bundles_post_ra>
// kernel: tpu_custom_call.1
= control target key start
LH: loop header
LB: loop body
LE: loop exit
PB: predicated region body
PF: predicated region fallthrough
CT: control target
= control target key end

     0   :  { %7 = vsyncpa [#allocation3], 0  ;;  %s610_s0 = inlined_call_operand.vmem [shape: f32[16,32], index: 0, kind: input, shape index: {}]   ;;  %s611_s1 = inlined_call_operand.vmem [shape: s32[16,1], index: 1, kind: input, shape index: {}]   ;;  %s612_s2 = inlined_call_operand.hbm [shape: f32[2,8,128], index: 2, kind: output, shape index: {}]  }
   0x1   :  { %9 = vsyncpa [#allocation3 + $0x1], 0  ;;  %s508_s9 = smov 0   ;;  %s510_s10 = smov 0  }
   0x2   :  { %s512_s11 = smov 0   ;;  %s514_s12 = smov 0  }
   0x3   :  { %s516_s13 = smov 0   ;;  %s518_s14 = smov 0  }
   0x4 LB: > { %s339_s15 = sadd.s32 4294967295, %s489_s14   ;;  %s340_s16 = sadd.s32 4294967294, %s489_s14   ;;  %s489_s14 = sphi %s518_s14, %s15_s14   ;;  %s485_s13 = sphi %s516_s13, %s619_s13   ;;  %s481_s12 = sphi %s514_s12, %s618_s12   ;;  %s477_s11 = sphi %s512_s11, %s617_s11   ;;  %s473_s10 = sphi %s510_s10, %s616_s10   ;;  %s469_s9 = sphi %s508_s9, %s615_s9  }
   0x5   : > { %s27_s17 = sadd.s32 1, %s485_s13  ;;  %s88_s18 = sadd.s32 1, %s477_s11 }
   0x6   : > { %p29_p0 = scmp.ge.s32.totalorder %s27_s17, 2  ;;  %p98_p1 = scmp.ne.s32.totalorder %s477_s11, %s473_s10 }
   0x7   : > { %p99_p2 = scmp.eq.s32.totalorder %s339_s15, 1  ;;  %p104_p3 = scmp.ne.s32.totalorder %s473_s10, %s469_s9 }
   0x8   : > { %s621_s17 = smov (%p29_p0, %s27_s17), 0  ;;  %p105_p5 = scmp.eq.s32.totalorder %s340_s16, 1 }
   0x9   : > { %p548_p4 = por %p99_p2, %p98_p1  ;;  %s85_s20 = ssub.s32 %s485_s13, %s621_s17 }
   0xa   : > { %p343_p6 = scmp.ge.s32.totalorder %s489_s14, 1  ;;  %p86_p7 = scmp.eq.s32.totalorder %s85_s20, 0 }
   0xb   : > { %p555_p8 = por %p105_p5, %p104_p3  ;;  %p140_p9 = scmp.lt.s32.totalorder %s489_s14, 3 }
   0xc   : > { %s561_s22 = scalar_select %p86_p7, %s477_s11, %s88_s18  }
   0xd   : > { %p141_p10 = pnand %p343_p6, %p140_p9 }
   0xe   : > { %p168_p11 = scmp.lt.s32.totalorder (!%p141_p10), %s481_s12, 1  ;;  %s165_s3 = sand.u32 (!%p141_p10), 1, %s473_s10  }
   0xf   : > { %144 = sbr.rel (%p141_p10) target bundleno = 515 (0x203), region = 28  ;;  %s344_s4 = sshll.u32 (!%p141_p10), %s165_s3, 3 }
  0x10   : > { %s348_s6 = sshll.u32 (!%p141_p10), %s481_s12, 7  ;;  %s167_s7 = scalar_lea.vmem (!%p141_p10), [#allocation2], %s344_s4 }
  0x11   : > { %s257_s8 = sshll.u32 (!%p141_p10), %s167_s7, 4  ;;  %s255_s20 = scalar_lea.hbm (!%p141_p10), %s612_s2, %s348_s6  ;;  %s258_s8 = int_to_ptr.vmem [resolvable:$true] %s257_s8 }
  0x12   : > { %s492_s25 = smov (!%p141_p10), [#allocation2]  }
  0x13   : > { %s417_s26 = sshll.u32 (!%p141_p10), %s492_s25, 4  ;;  %s418_s26 = int_to_ptr.vmem [resolvable:$false] %s417_s26 }
  0x14   : > { %v491_v0 = vmov 0   ;;  %s169_s23 = scalar_select %p168_p11, %s481_s12, 1  ;;  %v186_v2 = vlaneseq  ;;  %vm210_vm3 = vcmask 7168  }
  0x15   : > { %412 = vset.pattern.permute.xlu0 %v491_v0  ;;  %s419_s12 = scalar_lea.vmem %s418_s26, 256  ;;  %p420_p1 = scmp.lt.s32.totalorder %s258_s8, %s418_s26 }
  0x16   : > { %s345_s24 = sshll.u32 %s169_s23, 3  ;;  %v187_v3 = vand.u32 127, %v186_v2  ;;  %s244_s23 = scalar_lea.sflag [#allocation3], %s165_s3 }
  0x17   : > { %s178_s27 = scalar_lea.vmem %s611_s1, %s345_s24  ;;  %s174_s30 = scalar_lea.vmem %s610_s0, %s345_s24 }
  0x18   : > { %v185_v1 = vld [vmem:[%s178_s27] sm:$0xff]  ;;  %vm191_vm0 = vcmp.lt.s32.totalorder %v187_v3, 32  ;;  %s413_s24 = scalar_lea.vmem %s258_s8, 128 }
  0x19   : > { %199 = vperm.xlu0 %412, %v185_v1   ;;  %v184_v4 = vld [vmem:[%s174_s30] sm:$0xff]  ;;  %vm188_vm2 = vcmp.ne.s32.totalorder %v185_v1, 0  ;;  %p414_p12 = scmp.ne.s32.totalorder %s258_s8, %s413_s24  ;;  %p421_p2 = scmp.lt.s32.totalorder %s419_s12, %s413_s24 }
  0x1a   : > { %v192_v5 = vsel %vm191_vm0, %v184_v4, 0.0 }
  0x1b   : > { %v227_v12 = vmul.f32 0.0033333334, %v192_v5  ;;  %p415_p13 = pnand %p414_p12, %p548_p4  ;;  %p422_p3 = por %p421_p2, %p420_p1 }
  0x1d   : > { %v228_v15 = vsel %vm188_vm2, %v227_v12, 0.0  ;;  %p416_p0 = pneg %p415_p13 }
  0x1e   : > { %v230_v17 = vsel %vm210_vm3, %v228_v15, 0.0 }
  0x1f   : > { %p423_p5 = pnand %p422_p3, %p416_p0 }
  0x38   : > { %196 = vadd.xlane.f32.xlu0 %v192_v5 }
  0x94   : > { %v200_v6 = vpop.permute.xlu0 %199 }
  0x95   : > { %vm201_vm1 = vcmp.eq.s32.totalorder %v187_v3, %v200_v6 }
  0x96   : > { %v202_v7 = vsel %vm201_vm1, %v192_v5, 0.0 }
  0x97   : > { %203 = vadd.xlane.f32.xlu1 %v202_v7 }
  0xc1   : > { %v197_v8 = vpop.xlane.xlu0 %196 }
  0xc2   : > { %v205_v9 = vmul.f32 -0.0033333334, %v197_v8 }
 0x120   : > { %v204_v10 = vpop.xlane.xlu1 %203 }
 0x121   : > { %v206_v11 = vmul.f32 -0.89666665, %v204_v10 }
 0x123   : > { %v207_v13 = vadd.f32 %v206_v11, %v205_v9 }
 0x125   : > { %v208_v14 = vsel %vm188_vm2, %v207_v13, 0.0 }
 0x126   : > { %v211_v16 = vsel %vm210_vm3, %v208_v14, 0.0 }
 0x127   : > { %212 = vadd.xlane.f32.xlu1 %v211_v16 }
 0x12b   : > { %231 = vadd.xlane.f32.xlu1 %v230_v17 }
 0x1b0   : > { %v213_v18 = vpop.xlane.xlu1 %212 }
 0x1b1   : > { %v214_v19 = vrot.slane %v213_v18, 4 }
 0x1b3   : > { %v215_v20 = vadd.f32 %v214_v19, %v213_v18 }
 0x1b4   : > { %v232_v21 = vpop.xlane.xlu1 %231 }
 0x1b5   : > { %v216_v22 = vrot.slane %v215_v20, 2  ;;  %v233_v23 = vrot.slane %v232_v21, 4 }
 0x1b7   : > { %v234_v24 = vadd.f32 %v233_v23, %v232_v21  ;;  %v217_v25 = vadd.f32 %v216_v22, %v215_v20 }
 0x1b9   : > { %v235_v26 = vrot.slane %v234_v24, 2  ;;  %v218_v27 = vrot.slane %v217_v25, 1 }
 0x1bb   : > { %v236_v28 = vadd.f32 %v235_v26, %v234_v24  ;;  %v219_v29 = vadd.f32 %v218_v27, %v217_v25 }
 0x1bd   : > { %351 = vpush %v219_v29  ;;  %v237_v30 = vrot.slane %v236_v28, 1 }
 0x1bf   : > { %v238_v31 = vadd.f32 %v237_v30, %v236_v28 }
 0x1c1   : > { %353 = vpush %v238_v31 }
 0x1ee   : > { %s352_s5 = spop %351 }
 0x1ef   : > { %v221_v32 = vstv %s352_s5 }
 0x1f2   : > { %s354_s15 = spop %353 }
 0x1f3   : > { %v240_v33 = vstv %s354_s15 }
 0x1f4   : > { %v241_v34 = vadd.f32 %v240_v33, %v221_v32 }
 0x1f6   : > { %242 = vst [vmem:[%s167_s7] sm:$0xff] %v241_v34 }
 0x1f7   : > { %426 = shalt.err (!%p423_p5)
}
 0x1f8   : > { %s427_s27 = scalar_lea.hbm %s255_s20, 128  ;;  %s431_s30 = scalar_lea.hbm %s612_s2, 256 }
 0x1f9   : > { %p428_p6 = scmp.ne.s32.totalorder %s255_s20, %s427_s27  ;;  %p432_p10 = scmp.lt.s32.totalorder %s255_s20, %s612_s2 }
 0x1fa   : > { %p433_p11 = scmp.lt.s32.totalorder %s431_s30, %s427_s27 }
 0x1fb   : > { %p429_p7 = pnand %p428_p6, %p548_p4 }
 0x1fc   : > { %p434_p12 = por %p433_p11, %p432_p10 }
 0x1fd   : > { %p430_p9 = pneg %p429_p7 }
 0x1ff   : > { %p435_p13 = pnand %p434_p12, %p430_p9 }
 0x201   : > { %438 = shalt.err (!%p435_p13)
}
 0x202   : > { %355 = dma.vmem_to_hbm [thread:$0]  (%p548_p4), %s258_s8, 128, %s255_s20, %s244_s23  }
 0x203 PF: > { %p361_p0 = scmp.ge.s32.totalorder %s489_s14, 2  ;;  %s269_s5 = sand.u32 1, %s469_s9  }
 0x204   : > { %s270_s6 = scalar_lea.sflag [#allocation3], %s269_s5 }
 0x205   : > { %p358_p1 = pnand %p361_p0, %p555_p8 }
 0x207   : > { %p359_p2 = pneg %p358_p1 }
 0x209   : > { %464 = dma.done.wait (%p359_p2), %s270_s6, 128  }
 0x20a   : > { %466 = vsyncadd (%p359_p2), %s270_s6, 4294967168  ;;  %s15_s14 = sadd.s32 1, %s489_s14   ;;  %s615_s9 = smov %s473_s10 }
 0x20b   : > { %p12_p3 = scmp.ge.s32.totalorder %s15_s14, 4   ;;  %s616_s10 = smov %s477_s11 }
 0x20c   : > { %s617_s11 = smov %s561_s22  ;;  %s618_s12 = smov %s485_s13 }
 0x20d   : > { %s619_s13 = smov %s621_s17  ;;  %14 = sbr.rel (!%p12_p3) target bundleno = 4 (0x4), region = 74 }
 0x212   :  { %275 = vsyncpa [#allocation3], 1 }
 0x213   :  { %277 = vsyncpa [#allocation3 + $0x1], 1 }

</bundles_post_ra>
